<compile_context>
chip_gen: v5e
topology: v5e:2x2
jax: 0.10.0
libtpu: 0.0.40
codegen_flags: <defaults>
</compile_context>

<pallas_src>
import jax
import jax.numpy as jnp
from jax.experimental import pallas as pl
from jax.experimental.pallas import tpu as pltpu


def mean_pool_kernel(h_ref, m_ref, o_ref, acc_ref):
    """One (batch-tile, hidden-tile) output block, reduced over the S grid axis.

    h_ref:   (bb, ts, th)  hidden-state tile
    m_ref:   (bb, ts, 1)   attention-mask tile (f32, sublane-aligned with S)
    o_ref:   (bb, 1,  th)  masked-sum output tile (f32)
    acc_ref: (bb, 8,  th)  f32 running partial sums (scratch, 8 live sublanes)
    """
    s_idx = pl.program_id(2)

    @pl.when(s_idx == 0)
    def _init():
        acc_ref[...] = jnp.zeros_like(acc_ref)

    h = h_ref[...].astype(jnp.float32)          # exact upcast (bf16/f32 -> f32)
    m = m_ref[...]                              # (bb, ts, 1) f32 0/1 mask
    w = h * m                                   # VPU lane-broadcast multiply

    bb, ts, th = w.shape
    # Accumulate groups of 8 sublanes with plain vreg adds (no XLU work on the
    # per-block path); ts is a multiple of 8 by construction.
    acc_ref[...] += jnp.sum(w.reshape(bb, ts // 8, 8, th), axis=1)

    @pl.when(s_idx == pl.num_programs(2) - 1)
    def _finalize():
        # Single 8 -> 1 sublane (XLU) reduce per output tile.
        o_ref[...] = jnp.sum(acc_ref[...], axis=1, keepdims=True).astype(o_ref.dtype)


def _round_up(n, m):
    return ((n + m - 1) // m) * m


def _largest_divisor(n, target, multiple):
    """Largest d <= target with n % d == 0 and d % multiple == 0, else None."""
    best = None
    upper = min(n, target)
    for d in range(multiple, upper + 1, multiple):
        if n % d == 0:
            best = d
    return best


def _tpu_config():
    """(hidden-block budget bytes, vmem_limit_bytes, multi-TensorCore chip?)."""
    vmem_cap = None
    try:
        vmem_cap = getattr(pltpu.get_tpu_info(), "vmem_capacity_bytes", None)
    except Exception:
        vmem_cap = None
    if vmem_cap is not None and vmem_cap > 80 * 1024 * 1024:
        # v5e / v6e: 128 MiB VMEM, one TensorCore -> bigger blocks are free.
        return 16 * 1024 * 1024, 64 * 1024 * 1024, False
    if vmem_cap is not None:
        # v7x-class: 64 MiB VMEM per TensorCore, two TensorCores per chip.
        return 8 * 1024 * 1024, 40 * 1024 * 1024, True
    # Unknown: conservative settings that are safe on every generation.
    return 8 * 1024 * 1024, 40 * 1024 * 1024, False


def mean_pooling(last_hidden_state, attention_mask, *, seq_block=None):
    """Pallas TPU implementation of MeanPooling.forward.

    Args:
      last_hidden_state: (B, S, H) float array.
      attention_mask:    (B, S) array (bool / int / float, 0/1 values).
      seq_block:         optional cap on the sequence tile (testing hook).
    Returns:
      (B, H) float32 masked-mean embeddings.
    """
    B, S, H = last_hidden_state.shape

    mask_f = attention_mask.astype(jnp.float32)                       # (B, S)
    # Denominator (clamped token count) + final divide happen in the wrapper:
    # tiny XLA ops, and they keep the kernel epilogue to a single store.
    denom = jnp.maximum(jnp.sum(mask_f, axis=1, keepdims=True), jnp.float32(1e-9))

    budget, vmem_limit, multi_core = _tpu_config()
    itemsize = jnp.dtype(last_hidden_state.dtype).itemsize

    # ---- Tile selection --------------------------------------------------
    bb = _largest_divisor(B, 8, 1) or 1
    th = H                                  # full hidden dim: contiguous DMA rows

    # v7x: two TensorCores -> make sure a "parallel" grid axis has >= 2 steps.
    if multi_core and B // bb < 2:
        if B >= 2:
            bb = _largest_divisor(B, B // 2, 1) or 1
        else:
            cand = _largest_divisor(H, H // 2, 128)
            if cand is not None:
                th = cand

    # Shrink bb / split H only if even 8 sequence rows overflow the budget
    # (only reachable for absurdly large hidden dims).
    while bb > 1 and 8 * bb * th * itemsize > budget:
        bb = _largest_divisor(B, bb // 2, 1) or 1
    if 8 * bb * th * itemsize > budget:
        cand = _largest_divisor(H, H, 128)
        while cand is not None and 8 * bb * cand * itemsize > budget:
            cand = _largest_divisor(H, cand // 2, 128)
        if cand is not None:
            th = cand

    # Sequence tile (reduction axis): as many rows as the budget allows,
    # multiple of 8 (sublane), capped at 2048 rows.
    cap = (budget // (bb * th * itemsize)) // 8 * 8
    cap = max(8, min(cap, 2048))
    if seq_block is not None:
        cap = max(8, min(cap, (seq_block // 8) * 8))
    s_aligned = _round_up(S, 8)
    ts = _largest_divisor(s_aligned, cap, 8) or 8
    if ts < min(cap, 256) and s_aligned > cap:
        # No reasonably sized exact divisor: use the full cap and zero-pad the
        # sequence up to a multiple of it (mask-padded zeros keep sums exact).
        ts = cap
    s_padded = _round_up(S, ts)
    pad_s = s_padded - S

    h_in = last_hidden_state
    mask3 = mask_f[:, :, None]                                        # (B, S, 1)
    if pad_s:
        h_in = jnp.pad(h_in, ((0, 0), (0, pad_s), (0, 0)))
        mask3 = jnp.pad(mask3, ((0, 0), (0, pad_s), (0, 0)))

    grid = (B // bb, H // th, s_padded // ts)

    out = pl.pallas_call(
        mean_pool_kernel,
        out_shape=jax.ShapeDtypeStruct((B, 1, H), jnp.float32),
        grid_spec=pltpu.PrefetchScalarGridSpec(
            num_scalar_prefetch=0,
            grid=grid,
            in_specs=[
                pl.BlockSpec((bb, ts, th), lambda b, hi, s: (b, s, hi)),
                pl.BlockSpec((bb, ts, 1), lambda b, hi, s: (b, s, 0)),
            ],
            out_specs=pl.BlockSpec((bb, 1, th), lambda b, hi, s: (b, 0, hi)),
            scratch_shapes=[pltpu.VMEM((bb, 8, th), jnp.float32)],
        ),
        compiler_params=pltpu.CompilerParams(
            dimension_semantics=("parallel", "parallel", "arbitrary"),
            vmem_limit_bytes=vmem_limit,
        ),
    )(h_in, mask3)

    # (B, 1, H) -> (B, H) is layout-free; then the (clamped) mean divide.
    return out.reshape(B, H) / denom


def mean_pooling_ref(last_hidden_state, attention_mask):
    """Pure-JAX reference matching the PyTorch semantics."""
    m = attention_mask[..., None].astype(jnp.float32)
    sum_emb = jnp.sum(last_hidden_state.astype(jnp.float32) * m, axis=1)
    sum_mask = jnp.maximum(jnp.sum(m, axis=1), jnp.float32(1e-9))
    return sum_emb / sum_mask


if __name__ == "__main__":
    key = jax.random.PRNGKey(0)
    k_h, k_m, k2_h, k2_m = jax.random.split(key, 4)

    # Small shape consistent with the module (B=2, S=8, H=32), float32.
    B, S, H = 2, 8, 32
    last_hidden_state = jax.random.normal(k_h, (B, S, H), dtype=jnp.float32)
    attention_mask = (jax.random.uniform(k_m, (B, S)) > 0.3).astype(jnp.int32)

    out = jax.block_until_ready(mean_pooling(last_hidden_state, attention_mask))
    ref = mean_pooling_ref(last_hidden_state, attention_mask)
    assert out.shape == (B, H)
    assert jnp.allclose(out, ref, atol=1e-5, rtol=1e-5), "f32 mismatch vs reference"

    # Second check: exercises the tiled grid (multiple sequence steps ->
    # accumulator init/finalize across s) and bf16 inputs.
    B2, S2, H2 = 4, 384, 256
    h2 = jax.random.normal(k2_h, (B2, S2, H2), dtype=jnp.bfloat16)
    m2 = (jax.random.uniform(k2_m, (B2, S2)) > 0.25).astype(jnp.int32)
    out2 = jax.block_until_ready(mean_pooling(h2, m2, seq_block=128))
    ref2 = mean_pooling_ref(h2, m2)
    assert out2.shape == (B2, H2)
    assert jnp.allclose(out2, ref2, atol=1e-4, rtol=1e-4), "bf16 mismatch vs reference"

    print("KERNEL_OK")
</pallas_src>

<mosaic_0001>
module attributes {stable_mosaic.version = 11 : i64} {
  func.func @mean_pool_kernel(%arg0: i32, %arg1: i32, %arg2: i32, %arg3: memref<2x8x32xf32, #tpu.memory_space<vmem>>, %arg4: memref<2x8x1xf32, #tpu.memory_space<vmem>>, %arg5: memref<2x1x32xf32, #tpu.memory_space<vmem>>, %arg6: memref<2x8x32xf32, #tpu.memory_space<vmem>>) attributes {dimension_semantics = [#tpu.dimension_semantics<parallel>, #tpu.dimension_semantics<parallel>, #tpu.dimension_semantics<arbitrary>], iteration_bounds = array<i64: 1, 1, 1>, scalar_prefetch = 0 : i64, scratch_operands = 1 : i64, tpu.core_type = #tpu.core_type<tc>, window_params = [{transform_indices = @transform_0, window_bounds = array<i64: 2, 8, 32>}, {transform_indices = @transform_1, window_bounds = array<i64: 2, 8, 1>}, {transform_indices = @transform_2, window_bounds = array<i64: 2, 1, 32>}]} {
    %c0_i32 = arith.constant 0 : i32
    %0 = arith.cmpi eq, %arg2, %c0_i32 : i32
    %1 = arith.extui %0 : i1 to i32
    %c0_i32_0 = arith.constant 0 : i32
    %2 = arith.cmpi ne, %1, %c0_i32_0 : i32
    scf.if %2 {
      %cst_14 = arith.constant 0.000000e+00 : f32
      %15 = vector.broadcast %cst_14 : f32 to vector<2x8x32xf32>
      %c0_15 = arith.constant 0 : index
      %c0_16 = arith.constant 0 : index
      %c0_17 = arith.constant 0 : index
      %16 = vector.load %arg6[%c0_15, %c0_16, %c0_17] : memref<2x8x32xf32, #tpu.memory_space<vmem>>, vector<2x8x32xf32>
      tpu.vector_store %arg6[%c0_15, %c0_16, %c0_17], %15 {strides = array<i32>} : memref<2x8x32xf32, #tpu.memory_space<vmem>>, vector<2x8x32xf32>,
    } else {
    }
    %c0 = arith.constant 0 : index
    %c0_1 = arith.constant 0 : index
    %c0_2 = arith.constant 0 : index
    %3 = vector.load %arg3[%c0, %c0_1, %c0_2] : memref<2x8x32xf32, #tpu.memory_space<vmem>>, vector<2x8x32xf32>
    %c0_3 = arith.constant 0 : index
    %c0_4 = arith.constant 0 : index
    %c0_5 = arith.constant 0 : index
    %4 = vector.load %arg4[%c0_3, %c0_4, %c0_5] : memref<2x8x1xf32, #tpu.memory_space<vmem>>, vector<2x8x1xf32>
    %5 = vector.broadcast %4 : vector<2x8x1xf32> to vector<2x8x32xf32>
    %6 = arith.mulf %3, %5 : vector<2x8x32xf32>
    %c0_6 = arith.constant 0 : index
    %c0_7 = arith.constant 0 : index
    %c0_8 = arith.constant 0 : index
    %7 = vector.load %arg6[%c0_6, %c0_7, %c0_8] : memref<2x8x32xf32, #tpu.memory_space<vmem>>, vector<2x8x32xf32>
    %8 = vector.shape_cast %6 : vector<2x8x32xf32> to vector<2x1x8x32xf32>
    %cst = arith.constant dense<0.000000e+00> : vector<2x8x32xf32>
    %9 = vector.multi_reduction <add>, %8, %cst [1] : vector<2x1x8x32xf32> to vector<2x8x32xf32>
    %10 = arith.addf %7, %9 : vector<2x8x32xf32>
    %c0_9 = arith.constant 0 : index
    %c0_10 = arith.constant 0 : index
    %c0_11 = arith.constant 0 : index
    %11 = vector.load %arg6[%c0_9, %c0_10, %c0_11] : memref<2x8x32xf32, #tpu.memory_space<vmem>>, vector<2x8x32xf32>
    tpu.vector_store %arg6[%c0_9, %c0_10, %c0_11], %10 {strides = array<i32>} : memref<2x8x32xf32, #tpu.memory_space<vmem>>, vector<2x8x32xf32>,
    %c0_i32_12 = arith.constant 0 : i32
    %12 = arith.cmpi eq, %arg2, %c0_i32_12 : i32
    %13 = arith.extui %12 : i1 to i32
    %c0_i32_13 = arith.constant 0 : i32
    %14 = arith.cmpi ne, %13, %c0_i32_13 : i32
    scf.if %14 {
      %c0_14 = arith.constant 0 : index
      %c0_15 = arith.constant 0 : index
      %c0_16 = arith.constant 0 : index
      %15 = vector.load %arg6[%c0_14, %c0_15, %c0_16] : memref<2x8x32xf32, #tpu.memory_space<vmem>>, vector<2x8x32xf32>
      %cst_17 = arith.constant dense<0.000000e+00> : vector<2x32xf32>
      %16 = vector.multi_reduction <add>, %15, %cst_17 [1] : vector<2x8x32xf32> to vector<2x32xf32>
      %17 = vector.shape_cast %16 : vector<2x32xf32> to vector<2x1x32xf32>
      %c0_18 = arith.constant 0 : index
      %c0_19 = arith.constant 0 : index
      %c0_20 = arith.constant 0 : index
      %18 = vector.load %arg5[%c0_18, %c0_19, %c0_20] : memref<2x1x32xf32, #tpu.memory_space<vmem>>, vector<2x1x32xf32>
      tpu.vector_store %arg5[%c0_18, %c0_19, %c0_20], %17 {strides = array<i32>} : memref<2x1x32xf32, #tpu.memory_space<vmem>>, vector<2x1x32xf32>,
    } else {
    }
    return
  }
  func.func @transform_0(%arg0: i32, %arg1: i32, %arg2: i32) -> (i32, i32, i32) {
    %c0_i32 = arith.constant 0 : i32
    return %arg0, %arg2, %arg1 : i32, i32, i32
  }
  func.func @transform_1(%arg0: i32, %arg1: i32, %arg2: i32) -> (i32, i32, i32) {
    %c0_i32 = arith.constant 0 : i32
    %c0_i32_0 = arith.constant 0 : i32
    return %arg0, %arg2, %c0_i32 : i32, i32, i32
  }
  func.func @transform_2(%arg0: i32, %arg1: i32, %arg2: i32) -> (i32, i32, i32) {
    %c0_i32 = arith.constant 0 : i32
    %c0_i32_0 = arith.constant 0 : i32
    return %arg0, %c0_i32, %arg1 : i32, i32, i32
  }
}

</mosaic_0001>

<bundles_post_ra>
// kernel: tpu_custom_call.1
= control target key start
LH: loop header
LB: loop body
LE: loop exit
PB: predicated region body
PF: predicated region fallthrough
CT: control target
= control target key end

     0   :  { %s157_s0 = inlined_call_operand.vmem [shape: f32[2,8,32], index: 0, kind: input, shape index: {}]   ;;  %s158_s1 = inlined_call_operand.vmem [shape: f32[2,8,1], index: 1, kind: input, shape index: {}]   ;;  %s159_s2 = inlined_call_operand.hbm [shape: f32[2,1,32], index: 2, kind: output, shape index: {}]  }
   0x1   :  { %v21_v0 = vld [vmem:[%s158_s1] sm:$0xff] }
   0x2   :  { %7 = vsyncpa [#allocation4], 0  ;;  %v116_v1 = vmov 0   ;;  %v22_v2 = vld [vmem:[%s158_s1 + $0x8] sm:$0xff]  ;;  %vm16_vm0 = vcmask 261120   ;;  %v117_v3 = vmov 0.0  }
   0x3   :  { %89 = vset.pattern.permute.xlu0 %v116_v1  ;;  %17 = vst.msk [vmem:[#allocation2] sm:$0xff] %vm16_vm0, %v117_v3  ;;  %v19_v4 = vld [vmem:[%s157_s0] sm:$0xff]  ;;  %v20_v9 = vld [vmem:[%s157_s0 + $0x8] sm:$0xff]  ;;  %vm63_vm1 = vcmask 253952   ;;  %s118_s0 = smov [#allocation3]   ;;  %s72_s19 = sshll.u32 %s159_s2, 4  ;;  %s73_s19 = int_to_ptr.hbm [resolvable:$true] %s72_s19 }
   0x4   :  { %25 = vperm.xlu0 %89, %v21_v0   ;;  %18 = vst.msk [vmem:[#allocation2 + $0x8] sm:$0xff] %vm16_vm0, %v117_v3  ;;  %s70_s1 = sshll.u32 %s118_s0, 4  ;;  %s119_s20 = smov 16   ;;  %s71_s1 = int_to_ptr.vmem [resolvable:$true] %s70_s1 }
   0x5   :  { %s120_s21 = smov 1  }
   0xa   :  { %v35_v6 = vld [vmem:[#allocation2] sm:$0xff] }
   0xb   :  { %v36_v11 = vld [vmem:[#allocation2 + $0x8] sm:$0xff] }
   0xc   :  { %30 = vperm.xlu0 %89, %v22_v2  }
  0x76   :  { %v26_v5 = vpop.permute.xlu0 %25 }
  0x77   :  { %v33_v7 = vmul.f32 %v26_v5, %v19_v4 }
  0x79   :  { %v39_v8 = vadd.f32 %v35_v6, %v33_v7 }
  0x7b   :  { %42 = vst.msk [vmem:[#allocation2] sm:$0xff] %vm16_vm0, %v39_v8 }
  0x7e   :  { %v31_v10 = vpop.permute.xlu0 %30 }
  0x7f   :  { %v34_v12 = vmul.f32 %v31_v10, %v20_v9 }
  0x81   :  { %v40_v13 = vadd.f32 %v36_v11, %v34_v12 }
  0x82   :  { %v47_v14 = vld [vmem:[#allocation2] sm:$0xff] }
  0x83   :  { %43 = vst.msk [vmem:[#allocation2 + $0x8] sm:$0xff] %vm16_vm0, %v40_v13  ;;  %v49_v15 = vsel %vm16_vm0, %v47_v14, 0.0 }
  0x84   :  { %v50_v16 = vrot.slane %v49_v15, 4 }
  0x86   :  { %v51_v17 = vadd.f32 %v50_v16, %v49_v15 }
  0x88   :  { %v52_v18 = vrot.slane %v51_v17, 2 }
  0x8a   :  { %v48_v19 = vld [vmem:[#allocation2 + $0x8] sm:$0xff]  ;;  %v53_v20 = vadd.f32 %v52_v18, %v51_v17 }
  0x8b   :  { %v56_v21 = vsel %vm16_vm0, %v48_v19, 0.0 }
  0x8c   :  { %v54_v22 = vrot.slane %v53_v20, 1  ;;  %v57_v23 = vrot.slane %v56_v21, 4 }
  0x8e   :  { %v55_v24 = vadd.f32 %v54_v22, %v53_v20  ;;  %v58_v25 = vadd.f32 %v57_v23, %v56_v21 }
  0x90   :  { %v59_v26 = vrot.slane %v58_v25, 2  ;;  %64 = vst.msk [vmem:[#allocation3] sm:$0x1] %vm63_vm1, %v55_v24 }
  0x92   :  { %v60_v27 = vadd.f32 %v59_v26, %v58_v25 }
  0x94   :  { %v61_v28 = vrot.slane %v60_v27, 1 }
  0x96   :  { %v62_v29 = vadd.f32 %v61_v28, %v60_v27 }
  0x98   :  { %65 = vst.msk [vmem:[#allocation3 + $0x1] sm:$0x1] %vm63_vm1, %v62_v29 }
  0x99   :  { %78 = dma.vmem_to_hbm [thread:$0]  %s71_s1, 32, %s73_s19, [#allocation4], %s119_s20, %s119_s20, %s120_s21  }
  0x9a   :  { %114 = dma.done.wait [#allocation4], 32  }
  0x9b   :  { %115 = vsyncadd [#allocation4], 4294967264 }
  0x9c   :  { %83 = vsyncpa [#allocation4], 1 }

</bundles_post_ra>
